<compile_context>
chip_gen: v7x
topology: tpu7x:2x2x1
jax: 0.10.0
libtpu: 0.0.40
codegen_flags: <defaults>
</compile_context>

<pallas_src>
import functools

import jax
import jax.numpy as jnp
from jax.experimental import pallas as pl
from jax.experimental.pallas import tpu as pltpu


def _round_up(x, m):
    return ((x + m - 1) // m) * m


# ----------------------------- Pallas kernel -------------------------------

def gcn_fused_kernel(a_ref, dst_scale_ref, src_scale_ref, x_ref, *refs,
                     layer_dims):
    """Fused multi-layer GCN forward.

    refs = (w_0, b_0, w_1, b_1, ..., w_{L-1}, b_{L-1}, o_ref)
    layer_dims = ((f_in_0, f_out_0), ...) static per-layer (padded) dims.
    """
    o_ref = refs[-1]
    wb_refs = refs[:-1]
    n_layers = len(layer_dims)

    # Adjacency streamed as bf16 (0/1 exact); cast to f32 in-kernel (VPU, exact).
    a = a_ref[...].astype(jnp.float32)          # (N, N)
    dst = dst_scale_ref[...]                    # (N, 1) in_deg^{-1/2}
    src = src_scale_ref[...]                    # (N, 1) out_deg^{-1/2}
    h = x_ref[...].astype(jnp.float32)          # (N, F0)

    for li in range(n_layers):
        w = wb_refs[2 * li][...]                # (F_in, F_out)
        b = wb_refs[2 * li + 1][...]            # (1, F_out)
        f_in, f_out = layer_dims[li]

        h_src = h * src                         # source-side normalization (VPU)
        if f_out < f_in:
            # A @ (X W): keep the N x N matmul on the narrower operand.
            xw = jnp.dot(h_src, w, preferred_element_type=jnp.float32)
            h = jnp.dot(a, xw, preferred_element_type=jnp.float32)
        else:
            ax = jnp.dot(a, h_src, preferred_element_type=jnp.float32)
            h = jnp.dot(ax, w, preferred_element_type=jnp.float32)
        h = h * dst + b                         # destination normalization + bias
        if li != n_layers - 1:
            h = jnp.maximum(h, 0.0)             # ReLU on all but the last layer

    o_ref[...] = h.astype(o_ref.dtype)


# ------------------------------ wrapper (JAX) --------------------------------

def gcn_forward(adj, x, params):
    """Forward pass of the GCN stack (use_ln=False path of the PyTorch module)."""
    # TODO(synk): use_ln=True branch (BatchNorm1d with running-stats update) not
    # implemented; the module's default forward path (use_ln=False) is reproduced.
    n = adj.shape[0]
    adj_f32 = adj.astype(jnp.float32)

    # DGL norm='both': src features scaled by out_deg^{-1/2}, aggregated result
    # scaled by in_deg^{-1/2}; degrees clamped to >= 1.
    in_deg = jnp.clip(adj_f32.sum(axis=1), 1.0, None)    # incoming edges at dst i
    out_deg = jnp.clip(adj_f32.sum(axis=0), 1.0, None)   # outgoing edges at src j
    dst_scale = (in_deg ** -0.5).reshape(n, 1).astype(jnp.float32)
    src_scale = (out_deg ** -0.5).reshape(n, 1).astype(jnp.float32)

    # Raw 0/1 adjacency as bf16: exact, halves the dominant N^2 HBM stream.
    # TODO(synk): on v5e/v6e an int8 adjacency would cut it 4x; bf16 kept for v7x portability.
    a_bf16 = adj_f32.astype(jnp.bfloat16)

    n_layers = len(params)
    out_dim = params[-1][0].shape[1]
    out_dim_padded = _round_up(out_dim, 128)   # lane-dense final store

    kernel_args = [a_bf16, dst_scale, src_scale, x.astype(jnp.float32)]
    layer_dims = []
    for li, (w, b) in enumerate(params):
        w = w.astype(jnp.float32)
        b = b.astype(jnp.float32)
        if li == n_layers - 1 and out_dim_padded != out_dim:
            pad = out_dim_padded - out_dim
            w = jnp.pad(w, ((0, 0), (0, pad)))   # zero cols -> padded outputs are 0
            b = jnp.pad(b, ((0, pad),))
        layer_dims.append((w.shape[0], w.shape[1]))
        kernel_args.append(w)
        kernel_args.append(b.reshape(1, -1))

    out_padded = pl.pallas_call(
        functools.partial(gcn_fused_kernel, layer_dims=tuple(layer_dims)),
        out_shape=jax.ShapeDtypeStruct((n, out_dim_padded), jnp.float32),
        in_specs=[pl.BlockSpec(memory_space=pltpu.MemorySpace.VMEM)]
        * len(kernel_args),
        out_specs=pl.BlockSpec(memory_space=pltpu.MemorySpace.VMEM),
        compiler_params=pltpu.CompilerParams(
            vmem_limit_bytes=48 * 1024 * 1024),   # safe on v5e/v6e/v7x
    )(*kernel_args)
    return out_padded[:, :out_dim]


def init_gcn_params(key, in_dim, hid_dim, out_dim, n_layers):
    """Deterministic init mirroring GraphConv: xavier_uniform weight, zero bias."""
    if n_layers > 1:
        dims = [in_dim] + [hid_dim] * (n_layers - 1) + [out_dim]
    else:
        dims = [in_dim, hid_dim]
    params = []
    for li in range(len(dims) - 1):
        key, sub = jax.random.split(key)
        fan_in, fan_out = dims[li], dims[li + 1]
        bound = (6.0 / (fan_in + fan_out)) ** 0.5
        w = jax.random.uniform(sub, (fan_in, fan_out), jnp.float32, -bound, bound)
        b = jnp.zeros((fan_out,), jnp.float32)
        params.append((w, b))
    return params


# --------------------------------- main -------------------------------------

if __name__ == "__main__":
    key = jax.random.PRNGKey(0)
    k_adj, k_x, k_p = jax.random.split(key, 3)

    N = 16          # number of graph nodes
    in_dim = 8
    hid_dim = 32
    out_dim = 4
    n_layers = 2

    # Random undirected graph (symmetric adjacency, no self-loops).
    upper = (jax.random.uniform(k_adj, (N, N)) < 0.3).astype(jnp.float32)
    adj = jnp.triu(upper, k=1)
    adj = adj + adj.T

    x = jax.random.normal(k_x, (N, in_dim), jnp.float32)

    params = init_gcn_params(k_p, in_dim, hid_dim, out_dim, n_layers)

    out = gcn_forward(adj, x, params)
    jax.block_until_ready(out)
    assert out.shape == (N, out_dim)
    print("KERNEL_OK")
</pallas_src>

<mosaic_0001>
module attributes {stable_mosaic.version = 11 : i64} {
  func.func @gcn_fused_kernel(%arg0: memref<16x16xbf16, #tpu.memory_space<vmem>>, %arg1: memref<16x1xf32, #tpu.memory_space<vmem>>, %arg2: memref<16x1xf32, #tpu.memory_space<vmem>>, %arg3: memref<16x8xf32, #tpu.memory_space<vmem>>, %arg4: memref<8x32xf32, #tpu.memory_space<vmem>>, %arg5: memref<1x32xf32, #tpu.memory_space<vmem>>, %arg6: memref<32x128xf32, #tpu.memory_space<vmem>>, %arg7: memref<1x128xf32, #tpu.memory_space<vmem>>, %arg8: memref<16x128xf32, #tpu.memory_space<vmem>>) attributes {dimension_semantics = [], scalar_prefetch = 0 : i64, scratch_operands = 0 : i64, tpu.core_type = #tpu.core_type<tc>} {
    %c0 = arith.constant 0 : index
    %c0_0 = arith.constant 0 : index
    %0 = vector.load %arg0[%c0, %c0_0] : memref<16x16xbf16, #tpu.memory_space<vmem>>, vector<16x16xbf16>
    %1 = arith.extf %0 : vector<16x16xbf16> to vector<16x16xf32>
    %c0_1 = arith.constant 0 : index
    %c0_2 = arith.constant 0 : index
    %2 = vector.load %arg1[%c0_1, %c0_2] : memref<16x1xf32, #tpu.memory_space<vmem>>, vector<16x1xf32>
    %c0_3 = arith.constant 0 : index
    %c0_4 = arith.constant 0 : index
    %3 = vector.load %arg2[%c0_3, %c0_4] : memref<16x1xf32, #tpu.memory_space<vmem>>, vector<16x1xf32>
    %c0_5 = arith.constant 0 : index
    %c0_6 = arith.constant 0 : index
    %4 = vector.load %arg3[%c0_5, %c0_6] : memref<16x8xf32, #tpu.memory_space<vmem>>, vector<16x8xf32>
    %c0_7 = arith.constant 0 : index
    %c0_8 = arith.constant 0 : index
    %5 = vector.load %arg4[%c0_7, %c0_8] : memref<8x32xf32, #tpu.memory_space<vmem>>, vector<8x32xf32>
    %c0_9 = arith.constant 0 : index
    %c0_10 = arith.constant 0 : index
    %6 = vector.load %arg5[%c0_9, %c0_10] : memref<1x32xf32, #tpu.memory_space<vmem>>, vector<1x32xf32>
    %7 = vector.broadcast %3 : vector<16x1xf32> to vector<16x8xf32>
    %8 = arith.mulf %4, %7 : vector<16x8xf32>
    %cst = arith.constant dense<0.000000e+00> : vector<16x8xf32>
    %9 = tpu.matmul %1, %8, %cst {dimension_numbers = #tpu.dot_dimension_numbers<[1], [0], [0], [1], [0, 0, 1, 1], [], []>} : vector<16x16xf32>, vector<16x8xf32>, vector<16x8xf32> -> vector<16x8xf32>
    %cst_11 = arith.constant dense<0.000000e+00> : vector<16x32xf32>
    %10 = tpu.matmul %9, %5, %cst_11 {dimension_numbers = #tpu.dot_dimension_numbers<[1], [0], [0], [1], [0, 0, 1, 1], [], []>} : vector<16x8xf32>, vector<8x32xf32>, vector<16x32xf32> -> vector<16x32xf32>
    %11 = vector.broadcast %2 : vector<16x1xf32> to vector<16x32xf32>
    %12 = arith.mulf %10, %11 : vector<16x32xf32>
    %13 = vector.broadcast %6 : vector<1x32xf32> to vector<16x32xf32>
    %14 = arith.addf %12, %13 : vector<16x32xf32>
    %cst_12 = arith.constant 0.000000e+00 : f32
    %15 = vector.broadcast %cst_12 : f32 to vector<16x32xf32>
    %16 = arith.maximumf %14, %15 : vector<16x32xf32>
    %c0_13 = arith.constant 0 : index
    %c0_14 = arith.constant 0 : index
    %17 = vector.load %arg6[%c0_13, %c0_14] : memref<32x128xf32, #tpu.memory_space<vmem>>, vector<32x128xf32>
    %c0_15 = arith.constant 0 : index
    %c0_16 = arith.constant 0 : index
    %18 = vector.load %arg7[%c0_15, %c0_16] : memref<1x128xf32, #tpu.memory_space<vmem>>, vector<1x128xf32>
    %19 = vector.broadcast %3 : vector<16x1xf32> to vector<16x32xf32>
    %20 = arith.mulf %16, %19 : vector<16x32xf32>
    %cst_17 = arith.constant dense<0.000000e+00> : vector<16x32xf32>
    %21 = tpu.matmul %1, %20, %cst_17 {dimension_numbers = #tpu.dot_dimension_numbers<[1], [0], [0], [1], [0, 0, 1, 1], [], []>} : vector<16x16xf32>, vector<16x32xf32>, vector<16x32xf32> -> vector<16x32xf32>
    %cst_18 = arith.constant dense<0.000000e+00> : vector<16x128xf32>
    %22 = tpu.matmul %21, %17, %cst_18 {dimension_numbers = #tpu.dot_dimension_numbers<[1], [0], [0], [1], [0, 0, 1, 1], [], []>} : vector<16x32xf32>, vector<32x128xf32>, vector<16x128xf32> -> vector<16x128xf32>
    %23 = vector.broadcast %2 : vector<16x1xf32> to vector<16x128xf32>
    %24 = arith.mulf %22, %23 : vector<16x128xf32>
    %25 = vector.broadcast %18 : vector<1x128xf32> to vector<16x128xf32>
    %26 = arith.addf %24, %25 : vector<16x128xf32>
    %c0_19 = arith.constant 0 : index
    %c0_20 = arith.constant 0 : index
    %27 = vector.load %arg8[%c0_19, %c0_20] : memref<16x128xf32, #tpu.memory_space<vmem>>, vector<16x128xf32>
    tpu.vector_store %arg8[%c0_19, %c0_20], %26 {strides = array<i32>} : memref<16x128xf32, #tpu.memory_space<vmem>>, vector<16x128xf32>,
    return
  }
}

</mosaic_0001>

<bundles_post_ra>
// kernel: tpu_custom_call.1
= control target key start
LH: loop header
LB: loop body
LE: loop exit
PB: predicated region body
PF: predicated region fallthrough
CT: control target
= control target key end

     0   :  { %v539_v1 = vmov 0   ;;  %s646_s0 = inlined_call_operand.vmem [shape: bf16[16,16], index: 0, kind: input, shape index: {}]   ;;  %s647_s1 = inlined_call_operand.vmem [shape: f32[16,1], index: 1, kind: input, shape index: {}]   ;;  %s648_s2 = inlined_call_operand.vmem [shape: f32[16,1], index: 2, kind: input, shape index: {}]   ;;  %s649_s3 = inlined_call_operand.vmem [shape: f32[16,8], index: 3, kind: input, shape index: {}]   ;;  %s650_s4 = inlined_call_operand.vmem [shape: f32[8,32], index: 4, kind: input, shape index: {}]   ;;  %s651_s5 = inlined_call_operand.vmem [shape: f32[1,32], index: 5, kind: input, shape index: {}]   ;;  %s652_s6 = inlined_call_operand.vmem [shape: f32[32,128], index: 6, kind: input, shape index: {}]   ;;  %s653_s7 = inlined_call_operand.vmem [shape: f32[1,128], index: 7, kind: input, shape index: {}]   ;;  %s654_s8 = inlined_call_operand.hbm [shape: f32[16,128], index: 8, kind: output, shape index: {}]  }
   0x1   :  { %v36_v0 = vld [vmem:[%s648_s2] sm:$0xff]  ;;  %513 = vset.pattern.permute.xlu0 %v539_v1  ;;  %514 = vset.pattern.permute.xlu1 %v539_v1 }
   0x2   :  { %13 = vsyncpa [#allocation3], 0  ;;  %44 = vperm.xlu0 %513, %v36_v0   ;;  %v37_v2 = vld [vmem:[%s648_s2 + $0x8] sm:$0xff]  ;;  %v443_v3 = vld [vmem:[%s646_s0] sm:$0xff]   ;;  %vm54_vm0 = vcmask 130048   ;;  %vm136_vm1 = vcmask 64512  }
   0x3   :  { %v444_v4 = vunpack.c.l.bf16 %v443_v3  ;;  %v38_v6 = vld [vmem:[%s649_s3] sm:$0xff]  ;;  %v39_v7 = vld [vmem:[%s649_s3 + $0x8] sm:$0xff]  ;;  %v445_v12 = vunpack.c.h.bf16 %v443_v3  ;;  %v242_v20 = vld [vmem:[%s652_s6 + $0x10] sm:$0xff]  ;;  %vm322_vm2 = vcmask 261120   ;;  %s540_s26 = smov [#allocation2]  }
   0x4   :  { %v40_v13 = vld [vmem:[%s650_s4] sm:$0xff]  ;;  %v35_v15 = vld [vmem:[%s647_s1 + $0x8] sm:$0xff]  ;;  %v243_v22 = vld [vmem:[%s652_s6 + $0x18] sm:$0xff]  ;;  %s421_s27 = sshll.u32 %s540_s26, 4  ;;  %s422_s27 = int_to_ptr.vmem [resolvable:$true] %s421_s27 }
   0x5   :  { %467 = vmatprep.mubr.msk.f32.mxu0 %vm54_vm0, %v444_v4  ;;  %470 = vmatprep.subr.mxu1 %v40_v13  ;;  %v34_v14 = vld [vmem:[%s647_s1] sm:$0xff]  ;;  %v241_v19 = vld [vmem:[%s652_s6 + $0x8] sm:$0xff]  ;;  %v505_v23 = vpack.c.bf16 %v243_v22, %v242_v20  ;;  %s515_s28 = scalar_lea.vmem %s422_s27, 256  ;;  %p520_p1 = scmp.lt.s32.totalorder %s422_s27, %s422_s27 }
   0x6   :  { %49 = vperm.xlu0 %513, %v37_v2   ;;  %471 = vmatpush3.msra.mxu1 %v40_v13  ;;  %v240_v18 = vld [vmem:[%s652_s6] sm:$0xff]  ;;  %p516_p0 = scmp.ne.s32.totalorder %s422_s27, %s515_s28  ;;  %p521_p2 = scmp.lt.s32.totalorder %s515_s28, %s515_s28 }
   0x7   :  { %220 = vperm.xlu1 %514, %v34_v14   ;;  %v501_v21 = vpack.c.bf16 %v241_v19, %v240_v18  ;;  %v436_v26 = vld [vmem:[%s651_s5] ss:$0 sm:$0xff] }
   0x8   :  { %v441_v40 = vld [vmem:[%s653_s7] ss:$0 sm:$0xff]  ;;  %p522_p3 = por %p521_p2, %p520_p1 }
   0xa   :  { %p523_p4 = pnand %p522_p3, %p516_p0 }
   0xb   :  { %225 = vperm.xlu1 %514, %v35_v15  }
  0x81   :  { %v45_v5 = vpop.permute.xlu0 %44 }
  0x82   :  { %v52_v9 = vmul.f32 %v45_v5, %v38_v6 }
  0x85   :  { %v50_v8 = vpop.permute.xlu0 %49 }
  0x86   :  { %v53_v10 = vmul.f32 %v50_v8, %v39_v7  ;;  %v221_v24 = vpop.permute.xlu1 %220 }
  0x88   :  { %v493_v11 = vpack.c.bf16 %v53_v10, %v52_v9 }
  0x8a   :  { %494 = vmatprep.subr.bf16.mxu0 %v493_v11  ;;  %v226_v25 = vpop.permute.xlu1 %225 }
  0x8b   :  { %496 = vmatpush3.bf16.msra.mxu0 %v493_v11 }
  0x8c   :  { %502 = vmatprep.subr.bf16.mxu0 %v501_v21 }
  0x8e   :  { %468 = vmatmul.mubr.msk.f32.vlgmr.msra.gmra.mrb[0].mxu0 %vm54_vm0, %v445_v12 }
  0x8f   :  { %504 = vmatpush3.bf16.msra.mxu0 %v501_v21 }
  0x90   :  { %506 = vmatprep.subr.bf16.mxu0 %v505_v23 }
  0x93   :  { %508 = vmatpush3.bf16.msra.mxu0 %v505_v23 }
 0x161   :  { %v469_v16 = vpop.f32.mrb[0].mxu0 }
 0x162   :  { %v127_v17 = vpop.f32.mrb[1].mxu0 }
 0x163   :  { %472 = vmatprep.mubr.msk.f32.mxu1 %vm136_vm1, %v127_v17 }
 0x164   :  { %473 = vmatmul.mubr.msk.f32.vlgmr.msra.gmra.mrb[0].mxu1 %vm136_vm1, %v469_v16 }
 0x165   :  { %479 = vmatprep.mubr.msk.f32.mxu1 %vm54_vm0, %v444_v4 }
 0x237   :  { %v474_v27 = vpop.f32.mrb[0].mxu1 }
 0x238   :  { %v229_v28 = vmul.f32 %v474_v27, %v226_v25  ;;  %v209_v29 = vpop.f32.mrb[1].mxu1 }
 0x239   :  { %v228_v30 = vmul.f32 %v221_v24, %v209_v29 }
 0x23a   :  { %v237_v31 = vadd.f32 %v436_v26, %v229_v28 }
 0x23b   :  { %v236_v32 = vadd.f32 %v436_v26, %v228_v30 }
 0x23c   :  { %v239_v33 = vmax.f32 %v237_v31, 0.0 }
 0x23d   :  { %v238_v34 = vmax.f32 %v236_v32, 0.0 }
 0x23e   :  { %v246_v35 = vmul.f32 %v239_v33, %v50_v8 }
 0x23f   :  { %v245_v36 = vmul.f32 %v238_v34, %v45_v5 }
 0x241   :  { %v497_v37 = vpack.c.bf16 %v246_v35, %v245_v36 }
 0x243   :  { %498 = vmatprep.subr.bf16.mxu1 %v497_v37 }
 0x244   :  { %500 = vmatpush3.bf16.msra.mxu1 %v497_v37 }
 0x247   :  { %480 = vmatmul.mubr.msk.f32.vlgmr.msra.gmra.mrb[2].mxu1 %vm54_vm0, %v445_v12 }
 0x31a   :  { %v481_v38 = vpop.f32.mrb[2].mxu1 }
 0x31b   :  { %v313_v39 = vpop.f32.mrb[3].mxu1 }
 0x31c   :  { %490 = vmatprep.mubr.msk.f32.mxu0 %vm322_vm2, %v313_v39 }
 0x31d   :  { %491 = vmatmul.mubr.msk.f32.vlgmr.msra.gmra.mrb[2].mxu0 %vm322_vm2, %v481_v38 }
 0x3f0   :  { %v492_v41 = vpop.f32.mrb[2].mxu0 }
 0x3f1   :  { %v405_v42 = vmul.f32 %v492_v41, %v226_v25  ;;  %v395_v43 = vpop.f32.mrb[3].mxu0 }
 0x3f2   :  { %v404_v44 = vmul.f32 %v395_v43, %v221_v24 }
 0x3f3   :  { %v413_v45 = vadd.f32 %v441_v40, %v405_v42 }
 0x3f4   :  { %v412_v46 = vadd.f32 %v441_v40, %v404_v44 }
 0x3f5   :  { %415 = vst [vmem:[#allocation2 + $0x8] sm:$0xff] %v413_v45 }
 0x3f6   :  { %414 = vst [vmem:[#allocation2] sm:$0xff] %v412_v46 }
 0x3f7   :  { %526 = shalt.err (!%p523_p4)
}
 0x3f8   :  { %s527_s30 = scalar_lea.hbm %s654_s8, 256 }
 0x3f9   :  { %p528_p5 = scmp.ne.s32.totalorder %s654_s8, %s527_s30  ;;  %p531_p6 = scmp.lt.u32.totalorder %s527_s30, %s654_s8 }
 0x3fb   :  { %p533_p7 = pnand %p531_p6, %p528_p5 }
 0x3fd   :  { %536 = shalt.err (!%p533_p7)
}
 0x3fe   :  { %s541_s13 = smov 128   ;;  %s542_s14 = smov 8  }
 0x3ff   :  { %427 = dma.vmem_to_hbm [thread:$0]  %s422_s27, 256, %s654_s8, [#allocation3], %s541_s13, %s541_s13, %s542_s14  }
 0x400   :  { %537 = dma.done.wait [#allocation3], 256  }
 0x401   :  { %538 = vsyncadd [#allocation3], 4294967040 }
 0x402   :  { %431 = vsyncpa [#allocation3], 1 }

</bundles_post_ra>
